<compile_context>
chip_gen: v6e
topology: v6e:2x2x1
jax: 0.10.0
libtpu: 0.0.40
codegen_flags: <defaults>
</compile_context>

<pallas_src>
import jax
import jax.numpy as jnp
from jax.experimental import pallas as pl
from jax.experimental.pallas import tpu as pltpu


def _round_up(x, m):
    return ((x + m - 1) // m) * m


def _critic_kernel(x_ref, wf_ref, bf_ref, w2_ref, b2_ref, out_ref):
    """One (batch-column-chunk, position) grid step of the critic trunk.

    x_ref  : (1, Ctot, BBp)  inputs for position l, all batches in the chunk
    wf_ref : (F, Ctot)       fused encoder+fc1 weight
    bf_ref : (F, 1)          fused bias
    w2_ref : (F, F)          fc2 weight
    b2_ref : (F, 1)          fc2 bias
    out_ref: (F, BBp)        running sum over positions of relu(fc2(relu(.)))
    """
    # Init the resident accumulator on the first position step.
    @pl.when(pl.program_id(1) == 0)
    def _():
        out_ref[...] = jnp.zeros_like(out_ref)

    x = x_ref[0]                    # (Ctot, BBp), lane-dense
    wf = wf_ref[...]                # (F, Ctot)
    ctot = x.shape[0]

    # Stage 1 (fused encoders + fc1): K = Ctot is tiny, so keep it off the
    # MXU and do Ctot broadcast multiply-adds on the VPU instead.
    o1 = bf_ref[...] + wf[:, 0:1] * x[0:1, :]            # (F, BBp), f32
    for c in range(1, ctot):                              # Ctot-1 cheap FMAs
        o1 = o1 + wf[:, c:c + 1] * x[c:c + 1, :]
    o1 = jnp.maximum(o1, 0.0)

    # Stage 2 (fc2): one wide MXU matmul, N = BBp lane-dense.
    w2 = w2_ref[...]
    o2 = jnp.dot(w2, o1.astype(w2.dtype),
                 preferred_element_type=jnp.float32) + b2_ref[...]
    o2 = jnp.maximum(o2, 0.0)

    # Per-batch sum over L happens across the grid's position axis.
    out_ref[...] += o2


def state_critic_forward(static_ncl, dynamic_ncl, params, *,
                         col_block=4096, use_bf16_inputs=False):
    """static_ncl: (B, Cs, L), dynamic_ncl: (B, Cd, L) — PyTorch NCL layout."""
    B, Cs, L = static_ncl.shape
    _, Cd, _ = dynamic_ncl.shape
    (ws, bs, wd, bd, w1, b1, w2, b2, w3, b3) = params
    H = ws.shape[0]
    F = w1.shape[0]          # 20
    Ctot = Cs + Cd
    f32 = jnp.float32

    # ---- Host-side algebraic fusion of encoders + fc1 (conv k=1 == matmul).
    w1m = w1[:, :, 0].astype(f32)                    # (F, 2H)
    w1s, w1d = w1m[:, :H], w1m[:, H:]                # (F, H) each
    wsf = w1s @ ws[:, :, 0].astype(f32)              # (F, Cs)
    wdf = w1d @ wd[:, :, 0].astype(f32)              # (F, Cd)
    wf = jnp.concatenate([wsf, wdf], axis=1)         # (F, Ctot)
    bf = (w1s @ bs.astype(f32) + w1d @ bd.astype(f32)
          + b1.astype(f32)).reshape(F, 1)            # (F, 1)
    w2m = w2[:, :, 0].astype(f32)                    # (F, F)
    b2c = b2.astype(f32).reshape(F, 1)               # (F, 1)

    # ---- Batch-column tiling: batch rides the 128-lane axis.
    Bp = _round_up(B, 128)
    if Bp >= 256:
        # >=2 column chunks so v7x megacore shards the parallel grid axis.
        n_chunks = max(2, pl.cdiv(Bp, col_block))
        bbp = _round_up(pl.cdiv(Bp, n_chunks), 128)
        Bp = bbp * n_chunks
    else:
        n_chunks, bbp = 1, Bp

    # ---- One host-side relayout pass: concat channels, pad batch, put the
    # batch axis on lanes.  (TODO(synk): in a full pipeline this layout would
    # be produced directly by the upstream data producer.)
    in_dtype = jnp.bfloat16 if use_bf16_inputs else f32
    x = jnp.concatenate([static_ncl.astype(in_dtype),
                         dynamic_ncl.astype(in_dtype)], axis=1)   # (B, Ctot, L)
    x = jnp.pad(x, ((0, Bp - B), (0, 0), (0, 0)))                 # zero batches
    x = jnp.transpose(x, (2, 1, 0))                               # (L, Ctot, Bp)

    wf_k = wf.astype(in_dtype)
    w2_k = w2m.astype(in_dtype)

    grid = (n_chunks, L)           # reduction (position) axis innermost

    sums = pl.pallas_call(
        _critic_kernel,
        out_shape=jax.ShapeDtypeStruct((F, Bp), f32),
        grid=grid,
        in_specs=[
            pl.BlockSpec((1, Ctot, bbp), lambda i, l: (l, 0, i)),   # inputs
            pl.BlockSpec((F, Ctot), lambda i, l: (0, 0)),           # fused W
            pl.BlockSpec((F, 1), lambda i, l: (0, 0)),              # fused b
            pl.BlockSpec((F, F), lambda i, l: (0, 0)),              # fc2 W
            pl.BlockSpec((F, 1), lambda i, l: (0, 0)),              # fc2 b
        ],
        out_specs=pl.BlockSpec((F, bbp), lambda i, l: (0, i)),      # accumulator
        compiler_params=pltpu.CompilerParams(
            dimension_semantics=("parallel", "arbitrary"),
            vmem_limit_bytes=32 * 1024 * 1024),
    )(x, wf_k, bf, w2_k, b2c)

    # ---- fc3 folded after the (linear) sequence sum:
    #   sum_l (w3 @ o2[:, l] + b3) == w3 @ (sum_l o2) + L * b3
    w3m = w3[:, :, 0].astype(f32)                                  # (1, F)
    out = sums[:, :B].T @ w3m.T + jnp.float32(L) * b3.astype(f32)  # (B, 1)
    return out


# ----------------------------------------------------------------------------
# Parameter init + pure-JAX reference (mirrors the PyTorch module exactly).
# ----------------------------------------------------------------------------
def xavier_uniform(key, shape):
    # shape = (C_out, C_in, 1) for Conv1d weights.
    fan_out, fan_in = shape[0] * shape[2], shape[1] * shape[2]
    limit = (6.0 / (fan_in + fan_out)) ** 0.5
    return jax.random.uniform(key, shape, jnp.float32, -limit, limit)


def init_params(key, static_size, dynamic_size, hidden_size):
    ks = jax.random.split(key, 10)
    ws = xavier_uniform(ks[0], (hidden_size, static_size, 1))
    bs = jax.random.uniform(ks[1], (hidden_size,), jnp.float32, -0.1, 0.1)
    wd = xavier_uniform(ks[2], (hidden_size, dynamic_size, 1))
    bd = jax.random.uniform(ks[3], (hidden_size,), jnp.float32, -0.1, 0.1)
    w1 = xavier_uniform(ks[4], (20, hidden_size * 2, 1))
    b1 = jax.random.uniform(ks[5], (20,), jnp.float32, -0.1, 0.1)
    w2 = xavier_uniform(ks[6], (20, 20, 1))
    b2 = jax.random.uniform(ks[7], (20,), jnp.float32, -0.1, 0.1)
    w3 = xavier_uniform(ks[8], (1, 20, 1))
    b3 = jax.random.uniform(ks[9], (1,), jnp.float32, -0.1, 0.1)
    return (ws, bs, wd, bd, w1, b1, w2, b2, w3, b3)


def reference_forward(static_ncl, dynamic_ncl, params):
    (ws, bs, wd, bd, w1, b1, w2, b2, w3, b3) = params

    def conv1(x, w, b):  # x: (B, Cin, L), w: (Cout, Cin, 1)
        return jnp.einsum("bcl,oc->bol", x, w[:, :, 0]) + b[None, :, None]

    hs = conv1(static_ncl, ws, bs)
    hd = conv1(dynamic_ncl, wd, bd)
    hidden = jnp.concatenate([hs, hd], axis=1)
    o = jax.nn.relu(conv1(hidden, w1, b1))
    o = jax.nn.relu(conv1(o, w2, b2))
    o = conv1(o, w3, b3).sum(axis=2)
    return o


if __name__ == "__main__":
    B, L = 2, 8
    static_size, dynamic_size, hidden_size = 2, 3, 32

    key = jax.random.PRNGKey(0)
    k_static, k_dynamic, k_params = jax.random.split(key, 3)

    static = jax.random.uniform(k_static, (B, static_size, L), jnp.float32)
    dynamic = jax.random.uniform(k_dynamic, (B, dynamic_size, L), jnp.float32)
    params = init_params(k_params, static_size, dynamic_size, hidden_size)

    out = state_critic_forward(static, dynamic, params)
    out = jax.block_until_ready(out)

    ref = reference_forward(static, dynamic, params)
    assert out.shape == (B, 1), out.shape
    assert jnp.allclose(out, ref, atol=1e-3, rtol=1e-3), (out, ref)

    print("KERNEL_OK")
</pallas_src>

<mosaic_0001>
module attributes {stable_mosaic.version = 11 : i64} {
  func.func @_critic_kernel(%arg0: i32, %arg1: i32, %arg2: memref<1x5x128xf32, #tpu.memory_space<vmem>>, %arg3: memref<20x5xf32, #tpu.memory_space<vmem>>, %arg4: memref<20x1xf32, #tpu.memory_space<vmem>>, %arg5: memref<20x20xf32, #tpu.memory_space<vmem>>, %arg6: memref<20x1xf32, #tpu.memory_space<vmem>>, %arg7: memref<20x128xf32, #tpu.memory_space<vmem>>) attributes {dimension_semantics = [#tpu.dimension_semantics<parallel>, #tpu.dimension_semantics<arbitrary>], iteration_bounds = array<i64: 1, 8>, scalar_prefetch = 0 : i64, scratch_operands = 0 : i64, tpu.core_type = #tpu.core_type<tc>, window_params = [{transform_indices = @transform_0, window_bounds = array<i64: 1, 5, 128>}, {pipeline_mode = #tpu.pipeline_mode<synchronous>, transform_indices = @transform_1, window_bounds = array<i64: 20, 5>}, {pipeline_mode = #tpu.pipeline_mode<synchronous>, transform_indices = @transform_2, window_bounds = array<i64: 20, 1>}, {pipeline_mode = #tpu.pipeline_mode<synchronous>, transform_indices = @transform_3, window_bounds = array<i64: 20, 20>}, {pipeline_mode = #tpu.pipeline_mode<synchronous>, transform_indices = @transform_4, window_bounds = array<i64: 20, 1>}, {transform_indices = @transform_5, window_bounds = array<i64: 20, 128>}]} {
    %c0_i32 = arith.constant 0 : i32
    %0 = arith.cmpi eq, %arg1, %c0_i32 : i32
    %1 = arith.extui %0 : i1 to i32
    %c0_i32_0 = arith.constant 0 : i32
    %2 = arith.cmpi ne, %1, %c0_i32_0 : i32
    scf.if %2 {
      %cst_17 = arith.constant 0.000000e+00 : f32
      %50 = vector.broadcast %cst_17 : f32 to vector<20x128xf32>
      %c0_18 = arith.constant 0 : index
      %c0_19 = arith.constant 0 : index
      %51 = vector.load %arg7[%c0_18, %c0_19] : memref<20x128xf32, #tpu.memory_space<vmem>>, vector<20x128xf32>
      tpu.vector_store %arg7[%c0_18, %c0_19], %50 {strides = array<i32>} : memref<20x128xf32, #tpu.memory_space<vmem>>, vector<20x128xf32>,
    } else {
    }
    %c0 = arith.constant 0 : index
    %c0_1 = arith.constant 0 : index
    %c0_2 = arith.constant 0 : index
    %3 = vector.load %arg2[%c0, %c0_1, %c0_2] : memref<1x5x128xf32, #tpu.memory_space<vmem>>, vector<1x5x128xf32>
    %4 = vector.shape_cast %3 : vector<1x5x128xf32> to vector<5x128xf32>
    %c0_3 = arith.constant 0 : index
    %c0_4 = arith.constant 0 : index
    %5 = vector.load %arg3[%c0_3, %c0_4] : memref<20x5xf32, #tpu.memory_space<vmem>>, vector<20x5xf32>
    %c0_5 = arith.constant 0 : index
    %c0_6 = arith.constant 0 : index
    %6 = vector.load %arg4[%c0_5, %c0_6] : memref<20x1xf32, #tpu.memory_space<vmem>>, vector<20x1xf32>
    %7 = vector.extract_strided_slice %5 {offsets = [0, 0], sizes = [20, 1], strides = [1, 1]} : vector<20x5xf32> to vector<20x1xf32>
    %8 = vector.extract_strided_slice %4 {offsets = [0, 0], sizes = [1, 128], strides = [1, 1]} : vector<5x128xf32> to vector<1x128xf32>
    %9 = vector.broadcast %7 : vector<20x1xf32> to vector<20x128xf32>
    %10 = vector.broadcast %8 : vector<1x128xf32> to vector<20x128xf32>
    %11 = arith.mulf %9, %10 : vector<20x128xf32>
    %12 = vector.broadcast %6 : vector<20x1xf32> to vector<20x128xf32>
    %13 = arith.addf %12, %11 : vector<20x128xf32>
    %14 = vector.extract_strided_slice %5 {offsets = [0, 1], sizes = [20, 1], strides = [1, 1]} : vector<20x5xf32> to vector<20x1xf32>
    %15 = vector.extract_strided_slice %4 {offsets = [1, 0], sizes = [1, 128], strides = [1, 1]} : vector<5x128xf32> to vector<1x128xf32>
    %16 = vector.broadcast %14 : vector<20x1xf32> to vector<20x128xf32>
    %17 = vector.broadcast %15 : vector<1x128xf32> to vector<20x128xf32>
    %18 = arith.mulf %16, %17 : vector<20x128xf32>
    %19 = arith.addf %13, %18 : vector<20x128xf32>
    %20 = vector.extract_strided_slice %5 {offsets = [0, 2], sizes = [20, 1], strides = [1, 1]} : vector<20x5xf32> to vector<20x1xf32>
    %21 = vector.extract_strided_slice %4 {offsets = [2, 0], sizes = [1, 128], strides = [1, 1]} : vector<5x128xf32> to vector<1x128xf32>
    %22 = vector.broadcast %20 : vector<20x1xf32> to vector<20x128xf32>
    %23 = vector.broadcast %21 : vector<1x128xf32> to vector<20x128xf32>
    %24 = arith.mulf %22, %23 : vector<20x128xf32>
    %25 = arith.addf %19, %24 : vector<20x128xf32>
    %26 = vector.extract_strided_slice %5 {offsets = [0, 3], sizes = [20, 1], strides = [1, 1]} : vector<20x5xf32> to vector<20x1xf32>
    %27 = vector.extract_strided_slice %4 {offsets = [3, 0], sizes = [1, 128], strides = [1, 1]} : vector<5x128xf32> to vector<1x128xf32>
    %28 = vector.broadcast %26 : vector<20x1xf32> to vector<20x128xf32>
    %29 = vector.broadcast %27 : vector<1x128xf32> to vector<20x128xf32>
    %30 = arith.mulf %28, %29 : vector<20x128xf32>
    %31 = arith.addf %25, %30 : vector<20x128xf32>
    %32 = vector.extract_strided_slice %5 {offsets = [0, 4], sizes = [20, 1], strides = [1, 1]} : vector<20x5xf32> to vector<20x1xf32>
    %33 = vector.extract_strided_slice %4 {offsets = [4, 0], sizes = [1, 128], strides = [1, 1]} : vector<5x128xf32> to vector<1x128xf32>
    %34 = vector.broadcast %32 : vector<20x1xf32> to vector<20x128xf32>
    %35 = vector.broadcast %33 : vector<1x128xf32> to vector<20x128xf32>
    %36 = arith.mulf %34, %35 : vector<20x128xf32>
    %37 = arith.addf %31, %36 : vector<20x128xf32>
    %cst = arith.constant 0.000000e+00 : f32
    %38 = vector.broadcast %cst : f32 to vector<20x128xf32>
    %39 = arith.maximumf %37, %38 : vector<20x128xf32>
    %c0_7 = arith.constant 0 : index
    %c0_8 = arith.constant 0 : index
    %40 = vector.load %arg5[%c0_7, %c0_8] : memref<20x20xf32, #tpu.memory_space<vmem>>, vector<20x20xf32>
    %cst_9 = arith.constant dense<0.000000e+00> : vector<20x128xf32>
    %41 = tpu.matmul %40, %39, %cst_9 {dimension_numbers = #tpu.dot_dimension_numbers<[1], [0], [0], [1], [0, 0, 1, 1], [], []>} : vector<20x20xf32>, vector<20x128xf32>, vector<20x128xf32> -> vector<20x128xf32>
    %c0_10 = arith.constant 0 : index
    %c0_11 = arith.constant 0 : index
    %42 = vector.load %arg6[%c0_10, %c0_11] : memref<20x1xf32, #tpu.memory_space<vmem>>, vector<20x1xf32>
    %43 = vector.broadcast %42 : vector<20x1xf32> to vector<20x128xf32>
    %44 = arith.addf %41, %43 : vector<20x128xf32>
    %cst_12 = arith.constant 0.000000e+00 : f32
    %45 = vector.broadcast %cst_12 : f32 to vector<20x128xf32>
    %46 = arith.maximumf %44, %45 : vector<20x128xf32>
    %c0_13 = arith.constant 0 : index
    %c0_14 = arith.constant 0 : index
    %47 = vector.load %arg7[%c0_13, %c0_14] : memref<20x128xf32, #tpu.memory_space<vmem>>, vector<20x128xf32>
    %48 = arith.addf %47, %46 : vector<20x128xf32>
    %c0_15 = arith.constant 0 : index
    %c0_16 = arith.constant 0 : index
    %49 = vector.load %arg7[%c0_15, %c0_16] : memref<20x128xf32, #tpu.memory_space<vmem>>, vector<20x128xf32>
    tpu.vector_store %arg7[%c0_15, %c0_16], %48 {strides = array<i32>} : memref<20x128xf32, #tpu.memory_space<vmem>>, vector<20x128xf32>,
    return
  }
  func.func @transform_0(%arg0: i32, %arg1: i32) -> (i32, i32, i32) {
    %c0_i32 = arith.constant 0 : i32
    %c0_i32_0 = arith.constant 0 : i32
    return %arg1, %c0_i32, %arg0 : i32, i32, i32
  }
  func.func @transform_1(%arg0: i32, %arg1: i32) -> (i32, i32) {
    %c0_i32 = arith.constant 0 : i32
    %c0_i32_0 = arith.constant 0 : i32
    %c0_i32_1 = arith.constant 0 : i32
    return %c0_i32, %c0_i32_0 : i32, i32
  }
  func.func @transform_2(%arg0: i32, %arg1: i32) -> (i32, i32) {
    %c0_i32 = arith.constant 0 : i32
    %c0_i32_0 = arith.constant 0 : i32
    %c0_i32_1 = arith.constant 0 : i32
    return %c0_i32, %c0_i32_0 : i32, i32
  }
  func.func @transform_3(%arg0: i32, %arg1: i32) -> (i32, i32) {
    %c0_i32 = arith.constant 0 : i32
    %c0_i32_0 = arith.constant 0 : i32
    %c0_i32_1 = arith.constant 0 : i32
    return %c0_i32, %c0_i32_0 : i32, i32
  }
  func.func @transform_4(%arg0: i32, %arg1: i32) -> (i32, i32) {
    %c0_i32 = arith.constant 0 : i32
    %c0_i32_0 = arith.constant 0 : i32
    %c0_i32_1 = arith.constant 0 : i32
    return %c0_i32, %c0_i32_0 : i32, i32
  }
  func.func @transform_5(%arg0: i32, %arg1: i32) -> (i32, i32) {
    %c0_i32 = arith.constant 0 : i32
    %c0_i32_0 = arith.constant 0 : i32
    return %c0_i32, %arg0 : i32, i32
  }
}

</mosaic_0001>

<bundles_post_ra>
// kernel: tpu_custom_call.1
= control target key start
LH: loop header
LB: loop body
LE: loop exit
PB: predicated region body
PF: predicated region fallthrough
CT: control target
= control target key end

     0   :  { %10 = vsyncpa [#allocation3], 0  ;;  %s761_s18 = smov 0   ;;  %s763_s19 = smov 0   ;;  %s860_s0 = inlined_call_operand.vmem [shape: f32[8,5,128], index: 0, kind: input, shape index: {}]   ;;  %s861_s1 = inlined_call_operand.vmem [shape: f32[20,5], index: 1, kind: input, shape index: {}]   ;;  %s862_s2 = inlined_call_operand.vmem [shape: f32[20,1], index: 2, kind: input, shape index: {}]   ;;  %s863_s3 = inlined_call_operand.vmem [shape: f32[20,20], index: 3, kind: input, shape index: {}]   ;;  %s864_s4 = inlined_call_operand.vmem [shape: f32[20,1], index: 4, kind: input, shape index: {}]   ;;  %s865_s5 = inlined_call_operand.hbm [shape: f32[20,128], index: 5, kind: output, shape index: {}]  }
   0x1   :  { %s765_s20 = smov 0  }
   0x2 LB: > { %s572_s21 = sadd.s32 4294967295, %s718_s20   ;;  %s25_s22 = sadd.s32 1, %s714_s19  ;;  %s718_s20 = sphi %s765_s20, %s16_s20   ;;  %s714_s19 = sphi %s763_s19, %s868_s19   ;;  %s710_s18 = sphi %s761_s18, %s867_s18  }
   0x3   : > { %p26_p0 = scmp.ge.s32.totalorder %s25_s22, 8  ;;  %p575_p1 = scmp.ge.s32.totalorder %s718_s20, 1 }
   0x4   : > { %p204_p2 = scmp.lt.s32.totalorder %s718_s20, 9 }
   0x5   : > { %s870_s22 = smov (%p26_p0, %s25_s22), 0 }
   0x6   : > { %p205_p3 = pnand %p575_p1, %p204_p2 }
   0x7   : > { %p229_p4 = scmp.lt.s32.totalorder (!%p205_p3), %s710_s18, 7  ;;  %p577_p5 = scmp.ne.s32.totalorder (!%p205_p3), %s710_s18, 0 }
   0x8   : > { %208 = sbr.rel (%p205_p3) target bundleno = 409 (0x199), region = 40 }
   0xd   : > { %s230_s23 = scalar_select %p229_p4, %s710_s18, 7 }
   0xe   : > { %239 = sbr.rel (%p577_p5) target bundleno = 22 (0x16), region = 44 }
   0xf   : > { %s576_s24 = sshll.u32 %s230_s23, 3 }
  0x10   : > { %s783_s27 = scalar_lea.vmem %s860_s0, %s576_s24 }
  0x13   : > { %v720_v0 = vmov 0.0  }
  0x14   : > { %240 = vst [vmem:[#allocation2] sm:$0xff] %v720_v0  ;;  %241 = vst [vmem:[#allocation2 + $0x8] sm:$0xff] %v720_v0 }
  0x15   : > { %242 = vst [vmem:[#allocation2 + $0x10] sm:$0xf] %v720_v0 }
  0x16 PF: > { %v249_v1 = vld [vmem:[%s862_s2 + $0x10] sm:$0xf]  ;;  %v721_v3 = vmov 0   ;;  %v245_v4 = vld [vmem:[%s861_s1 + $0x8] sm:$0xff]  ;;  %v722_v5 = vmov 1   ;;  %v244_v6 = vld [vmem:[%s861_s1] sm:$0xff]  ;;  %v265_v18 = vlaneseq }
  0x17   : > { %v246_v2 = vld [vmem:[%s861_s1 + $0x10] sm:$0xf]  ;;  %655 = vset.pattern.permute.xlu1 %v721_v3  ;;  %654 = vset.pattern.permute.xlu0 %v721_v3  ;;  %v248_v7 = vld [vmem:[%s862_s2 + $0x8] sm:$0xff]  ;;  %v723_v8 = vmov 2   ;;  %v247_v9 = vld [vmem:[%s862_s2] sm:$0xff]  ;;  %v724_v10 = vmov 3  }
  0x18   : > { %284 = vperm.xlu1 %655, %v249_v1   ;;  %262 = vperm.xlu0 %654, %v246_v2   ;;  %v725_v11 = vmov 4   ;;  %v726_v12 = vmov 0.0   ;;  %vm727_vm0 = vmmov 0   ;;  %v384_v13 = vld [vmem:[%s864_s4] sm:$0xff]  ;;  %v385_v14 = vld [vmem:[%s864_s4 + $0x8] sm:$0xff]  ;;  %v266_v21 = vshrl.u32 %v265_v18, 7 }
  0x19   : > { %592 = vmatprep.subr.mxu0 %v726_v12  ;;  %607 = vmatprep.subr.mxu1 %v726_v12  ;;  %v386_v15 = vld [vmem:[%s864_s4 + $0x10] sm:$0xf]  ;;  %v243_v25 = vld [vmem:[%s783_s27] sm:$0x1f]  ;;  %vm412_vm1 = vcmask 1043456   ;;  %vm402_vm2 = vcmask 162816  }
  0x1a   : > { %598 = vmatprep.mubr.msk.f32.mxu0 %vm727_vm0, %v726_v12  ;;  %601 = vmatprep.mubr.msk.f32.mxu1 %vm727_vm0, %v726_v12  ;;  %v267_v23 = vsub.s32 0, %v266_v21  ;;  %v304_v26 = vsub.s32 1, %v266_v21  ;;  %v326_v29 = vsub.s32 2, %v266_v21  ;;  %v348_v32 = vsub.s32 3, %v266_v21  ;;  %v382_v18 = vld [vmem:[%s863_s3 + $0x8] sm:$0xff]  ;;  %s728_s6 = smov [#allocation2]  }
  0x1b   : > { %v370_v39 = vsub.s32 4, %v266_v21  ;;  %s516_s7 = sshll.u32 %s728_s6, 4  ;;  %p836_p6 = scmp.eq.s32.totalorder %s572_s21, 7  ;;  %s517_s7 = int_to_ptr.vmem [resolvable:$true] %s516_s7 }
  0x1c   : > { %656 = vset.pattern.permute.xlu1 %v722_v5  ;;  %257 = vperm.xlu0 %654, %v245_v4   ;;  %v268_v28 = vrot.slane %v243_v25, %v267_v23  ;;  %v305_v31 = vrot.slane %v243_v25, %v304_v26  ;;  %v327_v35 = vrot.slane %v243_v25, %v326_v29  ;;  %v499_v26 = vld [vmem:[#allocation2] sm:$0xff]  ;;  %s668_s9 = scalar_lea.vmem %s517_s7, 384  ;;  %p675_p10 = scmp.lt.s32.totalorder %s517_s7, %s517_s7 }
  0x1d   : > { %299 = vperm.xlu1 %656, %v246_v2   ;;  %v349_v38 = vrot.slane %v243_v25, %v348_v32  ;;  %v371_v45 = vrot.slane %v243_v25, %v370_v39  ;;  %p669_p7 = scmp.ne.s32.totalorder %s517_s7, %s668_s9  ;;  %p676_p11 = scmp.lt.s32.totalorder %s668_s9, %s668_s9 }
  0x1f   : > { %p670_p8 = pnand %p669_p7, %p836_p6  ;;  %p677_p12 = por %p676_p11, %p675_p10 }
  0x20   : > { %252 = vperm.xlu0 %654, %v244_v6  }
  0x21   : > { %657 = vset.pattern.permute.xlu1 %v721_v3  ;;  %p671_p9 = pneg %p670_p8 }
  0x22   : > { %279 = vperm.xlu1 %657, %v248_v7  }
  0x23   : > { %p678_p13 = pnand %p677_p12, %p671_p9 }
  0x24   : > { %658 = vset.pattern.permute.xlu0 %v722_v5 }
  0x25   : > { %295 = vperm.xlu0 %658, %v245_v4  }
  0x26   : > { %659 = vset.pattern.permute.xlu1 %v723_v8 }
  0x27   : > { %321 = vperm.xlu1 %659, %v246_v2  }
  0x29   : > { %291 = vperm.xlu0 %658, %v244_v6  }
  0x2b   : > { %660 = vset.pattern.permute.xlu1 %v721_v3 }
  0x2c   : > { %274 = vperm.xlu1 %660, %v247_v9  }
  0x2d   : > { %662 = vset.pattern.permute.xlu0 %v724_v10 }
  0x2e   : > { %343 = vperm.xlu0 %662, %v246_v2  }
  0x30   : > { %661 = vset.pattern.permute.xlu1 %v723_v8 }
  0x31   : > { %317 = vperm.xlu1 %661, %v245_v4  }
  0x32   : > { %664 = vset.pattern.permute.xlu0 %v725_v11 }
  0x33   : > { %365 = vperm.xlu0 %664, %v246_v2  }
  0x35   : > { %313 = vperm.xlu1 %661, %v244_v6  }
  0x37   : > { %357 = vperm.xlu0 %664, %v244_v6  }
  0x39   : > { %663 = vset.pattern.permute.xlu1 %v724_v10 }
  0x3a   : > { %339 = vperm.xlu1 %663, %v245_v4  }
  0x3b   : > { %667 = vset.pattern.permute.xlu0 %v721_v3 }
  0x3c   : > { %394 = vperm.xlu0 %667, %v385_v14  }
  0x3e   : > { %335 = vperm.xlu1 %663, %v244_v6  }
  0x42   : > { %665 = vset.pattern.permute.xlu1 %v725_v11 }
  0x43   : > { %361 = vperm.xlu1 %665, %v245_v4  }
  0x47   : > { %666 = vset.pattern.permute.xlu1 %v721_v3 }
  0x48   : > { %389 = vperm.xlu1 %666, %v384_v13  }
  0x4c   : > { %399 = vperm.xlu1 %666, %v386_v15  }
  0x93   : > { %v285_v16 = vpop.permute.xlu1 %284  ;;  %v263_v17 = vpop.permute.xlu0 %262 }
  0x94   : > { %v271_v34 = vmul.f32 %v268_v28, %v263_v17  ;;  %v381_v17 = vld [vmem:[%s863_s3] sm:$0xff] }
  0x96   : > { %v289_v40 = vadd.f32 %v285_v16, %v271_v34 }
  0x97   : > { %v258_v19 = vpop.permute.xlu0 %257 }
  0x98   : > { %v300_v20 = vpop.permute.xlu1 %299  ;;  %v270_v55 = vmul.f32 %v268_v28, %v258_v19  ;;  %v383_v19 = vld [vmem:[%s863_s3 + $0x10] sm:$0xf] }
  0x99   : > { %v308_v36 = vmul.f32 %v305_v31, %v300_v20 }
  0x9b   : > { %v253_v22 = vpop.permute.xlu0 %252  ;;  %v311_v43 = vadd.f32 %v308_v36, %v289_v40  ;;  %v501_v36 = vld [vmem:[#allocation2 + $0x10] sm:$0xf] }
  0x9c   : > { %v269_v53 = vmul.f32 %v268_v28, %v253_v22 }
  0x9d   : > { %v280_v24 = vpop.permute.xlu1 %279 }
  0x9e   : > { %v288_v61 = vadd.f32 %v280_v24, %v270_v55 }
  0xa0   : > { %v296_v27 = vpop.permute.xlu0 %295 }
  0xa1   : > { %v307_v59 = vmul.f32 %v305_v31, %v296_v27  ;;  %v500_v27 = vld [vmem:[#allocation2 + $0x8] sm:$0xff] }
  0xa2   : > { %v322_v30 = vpop.permute.xlu1 %321 }
  0xa3   : > { %v330_v41 = vmul.f32 %v327_v35, %v322_v30  ;;  %v310_v3 = vadd.f32 %v307_v59, %v288_v61 }
  0xa4   : > { %v292_v33 = vpop.permute.xlu0 %291 }
  0xa5   : > { %v333_v47 = vadd.f32 %v330_v41, %v311_v43  ;;  %v306_v56 = vmul.f32 %v305_v31, %v292_v33 }
  0xa7   : > { %v275_v37 = vpop.permute.xlu1 %274 }
  0xa8   : > { %v287_v57 = vadd.f32 %v275_v37, %v269_v53 }
  0xa9   : > { %v344_v42 = vpop.permute.xlu0 %343 }
  0xaa   : > { %v352_v44 = vmul.f32 %v349_v38, %v344_v42  ;;  %v309_v62 = vadd.f32 %v306_v56, %v287_v57 }
  0xac   : > { %v318_v46 = vpop.permute.xlu1 %317  ;;  %v355_v49 = vadd.f32 %v352_v44, %v333_v47 }
  0xad   : > { %v329_v63 = vmul.f32 %v327_v35, %v318_v46 }
  0xae   : > { %v366_v48 = vpop.permute.xlu0 %365 }
  0xaf   : > { %v374_v50 = vmul.f32 %v371_v45, %v366_v48  ;;  %v332_v6 = vadd.f32 %v329_v63, %v310_v3 }
  0xb0   : > { %v314_v51 = vpop.permute.xlu1 %313 }
  0xb1   : > { %v377_v52 = vadd.f32 %v374_v50, %v355_v49  ;;  %v328_v60 = vmul.f32 %v327_v35, %v314_v51 }
  0xb2   : > { %v358_v2 = vpop.permute.xlu0 %357 }
  0xb3   : > { %v380_v54 = vmax.f32 %v377_v52, 0.0  ;;  %v331_v4 = vadd.f32 %v328_v60, %v309_v62  ;;  %v372_v8 = vmul.f32 %v371_v45, %v358_v2 }
  0xb5   : > { %v340_v58 = vpop.permute.xlu1 %339  ;;  %593 = vmatpush3.msk.msra.mxu0 %vm412_vm1, %v380_v54  ;;  %610 = vmatpush3.msk.msra.mxu1 %vm412_vm1, %v380_v54 }
  0xb6   : > { %594 = vmatprep.subr.mxu0 %v726_v12  ;;  %608 = vmatprep.subr.mxu1 %v726_v12  ;;  %v351_v5 = vmul.f32 %v349_v38, %v340_v58 }
  0xb7   : > { %v395_v21 = vpop.permute.xlu0 %394 }
  0xb8   : > { %v354_v10 = vadd.f32 %v351_v5, %v332_v6 }
  0xb9   : > { %v336_v0 = vpop.permute.xlu1 %335 }
  0xba   : > { %v350_v1 = vmul.f32 %v349_v38, %v336_v0 }
  0xbc   : > { %v353_v7 = vadd.f32 %v350_v1, %v331_v4 }
  0xbe   : > { %v362_v9 = vpop.permute.xlu1 %361  ;;  %v375_v13 = vadd.f32 %v372_v8, %v353_v7 }
  0xbf   : > { %v373_v11 = vmul.f32 %v371_v45, %v362_v9 }
  0xc0   : > { %v378_v16 = vmax.f32 %v375_v13, 0.0 }
  0xc1   : > { %v376_v14 = vadd.f32 %v373_v11, %v354_v10 }
  0xc3   : > { %v379_v15 = vmax.f32 %v376_v14, 0.0  ;;  %v390_v20 = vpop.permute.xlu1 %389 }
  0xc5   : > { %595 = vmatpush3.msra.mxu0 %v379_v15  ;;  %611 = vmatpush3.msra.mxu1 %v379_v15 }
  0xc6   : > { %596 = vmatprep.subr.mxu0 %v726_v12  ;;  %609 = vmatprep.subr.mxu1 %v726_v12 }
  0xc7   : > { %597 = vmatpush3.msra.mxu0 %v378_v16  ;;  %612 = vmatpush3.msra.mxu1 %v378_v16  ;;  %v400_v32 = vpop.permute.xlu1 %399 }
  0xc8   : > { %599 = vmatmul.mubr.msk.f32.vlgmr.msra.gmra.mxu0 %vm402_vm2, %v381_v17  ;;  %602 = vmatmul.mubr.msk.f32.vlgmr.msra.gmra.mxu1 %vm402_vm2, %v382_v18 }
  0xc9   : > { %604 = vmatprep.mubr.msk.f32.mxu1 %vm727_vm0, %v726_v12 }
  0xcc   : > { %605 = vmatmul.mubr.msk.f32.gmra.mxu1 %vm402_vm2, %v383_v19 }
 0x188   : > { %v482_v22 = vpop.f32.mrf.mxu0  ;;  %v487_v23 = vpop.f32.mrf.mxu1 }
 0x189   : > { %v483_v24 = vadd.f32 %v482_v22, %v390_v20  ;;  %v488_v25 = vadd.f32 %v487_v23, %v395_v21 }
 0x18a   : > { %v603_v28 = vpop.f32.mrf.mxu1  ;;  %v600_v29 = vpop.f32.mrf.mxu0 }
 0x18b   : > { %v496_v30 = vmax.f32 %v483_v24, 0.0  ;;  %v497_v31 = vmax.f32 %v488_v25, 0.0 }
 0x18c   : > { %v492_v12 = vpop.f32.mrf.mxu1 }
 0x18d   : > { %v502_v33 = vadd.f32 %v499_v26, %v496_v30  ;;  %v503_v34 = vadd.f32 %v500_v27, %v497_v31  ;;  %v493_v35 = vadd.f32 %v492_v12, %v400_v32 }
 0x18e   : > { %v606_v37 = vpop.f32.mrf.mxu1 }
 0x18f   : > { %505 = vst [vmem:[#allocation2] sm:$0xff] %v502_v33  ;;  %506 = vst [vmem:[#allocation2 + $0x8] sm:$0xff] %v503_v34  ;;  %v498_v38 = vmax.f32 %v493_v35, 0.0 }
 0x191   : > { %v504_v39 = vadd.f32 %v501_v36, %v498_v38 }
 0x193   : > { %507 = vst [vmem:[#allocation2 + $0x10] sm:$0xf] %v504_v39 }
 0x194   : > { %681 = shalt.err (!%p678_p13)
}
 0x195   : > { %s729_s10 = smov 128   ;;  %s730_s21 = smov 8  }
 0x196   : > { %614 = dma.vmem_to_hbm [thread:$0]  (%p836_p6), %s517_s7, 384, %s865_s5, [#allocation3], %s729_s10, %s729_s10, %s730_s21  }
 0x197   : > { %705 = dma.done.wait (%p836_p6), [#allocation3], 384  }
 0x198   : > { %707 = vsyncadd (%p836_p6), [#allocation3], 4294966912 }
 0x199 PF: > { %s16_s20 = sadd.s32 1, %s718_s20   ;;  %s867_s18 = smov %s714_s19 }
 0x19a   : > { %p13_p0 = scmp.ge.s32.totalorder %s16_s20, 10   ;;  %s868_s19 = smov %s870_s22 }
 0x19c   :  { %15 = sbr.rel (!%p13_p0) target bundleno = 2 (0x2), region = 72 }
 0x1a1   :  { %532 = vsyncpa [#allocation3], 1 }
 0x1a2   :  { %534 = vsyncpa [#allocation3 + $0x1], 1 }

</bundles_post_ra>
